<compile_context>
chip_gen: v5e
topology: v5e:2x2
jax: 0.10.0
libtpu: 0.0.40
codegen_flags: <defaults>
</compile_context>

<pallas_src>
import jax
import jax.numpy as jnp
from jax import lax
from jax.experimental import pallas as pl
from jax.experimental.pallas import tpu as pltpu

# Fixed Sobel filter taps (identical to the torch tensors in __init__).
SOBEL_DX = ((-1.0, -2.0, -1.0),
            ( 0.0,  0.0,  0.0),
            ( 1.0,  2.0,  1.0))
SOBEL_DY = ((-1.0,  0.0,  1.0),
            (-2.0,  0.0,  2.0),
            (-1.0,  0.0,  1.0))

_DEFAULT_VMEM_CAP = 64 * 1024 * 1024   # v7x physical VMEM per core (safe lower bound)


def _wpass(a, use_roll):
    """[1,2,1] smoothing and [-1,0,1] difference along W with zero borders.

    a: (B, R, W) float32. Returns (s_w, d_w), both (B, R, W).
    """
    W = a.shape[-1]
    if use_roll:
        col = lax.broadcasted_iota(jnp.int32, (1, 1, W), 2)
        left = jnp.where(col == 0, 0.0, pltpu.roll(a, 1, axis=2))
        right = jnp.where(col == W - 1, 0.0, pltpu.roll(a, W - 1, axis=2))
    else:
        z = jnp.zeros(a.shape[:-1] + (1,), a.dtype)
        left = jnp.concatenate([z, a[:, :, :W - 1]], axis=2)
        right = jnp.concatenate([a[:, :, 1:], z], axis=2)
    return left + 2.0 * a + right, right - left


def _h_neighbors(a, top, bot, use_roll):
    """Row neighbours along H: prev[j]=a[j-1] (top at j=0), next[j]=a[j+1] (bot at j=TH-1).

    a: (B, TH, W); top/bot: (B, 1, W).
    """
    TH, W = a.shape[1], a.shape[2]
    if use_roll:
        row = lax.broadcasted_iota(jnp.int32, (1, TH, W), 1)
        prev = jnp.where(row == 0, top, pltpu.roll(a, 1, axis=1))
        nxt = jnp.where(row == TH - 1, bot, pltpu.roll(a, TH - 1, axis=1))
    else:
        prev = jnp.concatenate([top, a[:, :TH - 1, :]], axis=1)
        nxt = jnp.concatenate([a[:, 1:, :], bot], axis=1)
    return prev, nxt


def _sobel_kernel(x_ref, up_ref, dn_ref, o_ref):
    """One grid step: BN batch items x one TH-row tile.

    x_ref : (BN, C, TH, W)  image rows [t*TH, t*TH+TH)
    up_ref: (BN, C, R, W)   8-row block whose last row is image row t*TH - 1
    dn_ref: (BN, C, R, W)   8-row block whose first row is image row t*TH + TH
    o_ref : (BN, out_c, TH, W)
    """
    BN, C, TH, W = x_ref.shape
    Ru = up_ref.shape[2]
    t = pl.program_id(1)
    nt = pl.num_programs(1)

    use_roll_w = (W % 128 == 0)
    use_roll_h = (TH % 8 == 0)

    x = x_ref[...].reshape(BN * C, TH, W)
    # Neighbour rows above/below this tile; zeros at the image border (padding=1).
    top = jnp.where(t == 0, 0.0, up_ref[:, :, Ru - 1:Ru, :]).reshape(BN * C, 1, W)
    bot = jnp.where(t == nt - 1, 0.0, dn_ref[:, :, 0:1, :]).reshape(BN * C, 1, W)

    # Separable decomposition shared by dx and dy:
    #   dx = diff_H(smooth_W(x)),  dy = smooth_H(diff_W(x))
    s_w, d_w = _wpass(x, use_roll_w)
    s_t, d_t = _wpass(top, use_roll_w)
    s_b, d_b = _wpass(bot, use_roll_w)

    s_prev, s_next = _h_neighbors(s_w, s_t, s_b, use_roll_h)
    d_prev, d_next = _h_neighbors(d_w, d_t, d_b, use_roll_h)

    dx = (s_next - s_prev).reshape(BN, C, TH, W)
    dy = (d_prev + 2.0 * d_w + d_next).reshape(BN, C, TH, W)

    if C == 2:
        # torch.cat([dx(ch0), dy(ch1), dx(ch1), dy(ch0)], dim=1)
        o_ref[:, 0, :, :] = dx[:, 0]
        o_ref[:, 1, :, :] = dy[:, 1]
        o_ref[:, 2, :, :] = dx[:, 1]
        o_ref[:, 3, :, :] = dy[:, 0]
    else:
        o_ref[:, 0, :, :] = dx[:, 0]
        o_ref[:, 1, :, :] = dy[:, 0]


def sobel_pallas(image, in_channels=2, *, h_tile_rows=None, batch_block=None):
    """Pallas equivalent of SobelTorch.forward (precision='32').

    image: (N, in_channels, H, W) NCHW. Returns float32 (N, out_c, H, W).
    h_tile_rows / batch_block override the automatic tiling (for testing).
    """
    assert in_channels in (1, 2)
    N, C, H, W = image.shape
    assert C == in_channels and H >= 1 and W >= 1
    out_c = 2 * in_channels
    x = image.astype(jnp.float32)

    # ---- generation-aware VMEM sizing ---------------------------------------
    try:
        vmem_cap = int(pltpu.get_tpu_info().vmem_capacity_bytes)
    except Exception:
        vmem_cap = _DEFAULT_VMEM_CAP
    budget = max(vmem_cap // 3, 4 * 1024 * 1024)          # working set incl. temps
    vmem_limit = int(min(vmem_cap * 3 // 4, 100 * 1024 * 1024))

    def workset(bn, th):
        io_bufs = 2 * (C + out_c) * bn * th * W * 4        # double-buffered in/out
        halo_bufs = 2 * 2 * C * bn * 8 * W * 4             # two 8-row halo streams
        temps = 6 * C * bn * th * W * 4                    # s/d passes, rolls, dx, dy
        return io_bufs + halo_bufs + temps

    # ---- tile choice ---------------------------------------------------------
    if h_tile_rows is not None:
        TH = int(h_tile_rows)
        BN = int(batch_block) if batch_block is not None else 1
        assert H % TH == 0 and (TH == H or TH % 8 == 0) and N % BN == 0
    elif workset(1, H) <= budget:
        # Small/medium images: whole image per step, fold batch items, but keep
        # at least 2 grid steps when N >= 2 so both v7x TensorCores get work.
        TH = H
        BN = 1
        bn_cap = max(N // 2, 1)
        for d in range(1, bn_cap + 1):
            if N % d == 0 and workset(d, H) <= budget:
                BN = d
    else:
        # Large images: one batch item per step, tile along H (8-row aligned).
        BN = 1
        TH = None
        for d in range(8, H, 8):
            if H % d == 0 and workset(1, d) <= budget:
                TH = d
        if TH is None:
            TH = H   # no aligned divisor fits; rely on the raised vmem limit

    T = H // TH
    NB = N // BN
    halo_rows = 8 if H >= 8 else H

    # ---- BlockSpecs (up/dn are extra windows onto the SAME input array) ------
    main_spec = pl.BlockSpec((BN, C, TH, W), lambda nb, t: (nb, 0, t, 0))
    out_spec = pl.BlockSpec((BN, out_c, TH, W), lambda nb, t: (nb, 0, t, 0))
    if T == 1:
        up_spec = pl.BlockSpec((BN, C, halo_rows, W), lambda nb, t: (nb, 0, 0, 0))
        dn_spec = pl.BlockSpec((BN, C, halo_rows, W), lambda nb, t: (nb, 0, 0, 0))
    else:
        thb = TH // 8          # T > 1 implies TH % 8 == 0 and H % 8 == 0
        nrb = H // 8
        up_spec = pl.BlockSpec(
            (BN, C, 8, W),
            lambda nb, t: (nb, 0, jnp.maximum(t * thb - 1, 0), 0))
        dn_spec = pl.BlockSpec(
            (BN, C, 8, W),
            lambda nb, t: (nb, 0, jnp.minimum((t + 1) * thb, nrb - 1), 0))

    return pl.pallas_call(
        _sobel_kernel,
        out_shape=jax.ShapeDtypeStruct((N, out_c, H, W), jnp.float32),
        grid_spec=pltpu.PrefetchScalarGridSpec(
            num_scalar_prefetch=0,
            grid=(NB, T),
            in_specs=[main_spec, up_spec, dn_spec],
            out_specs=out_spec,
        ),
        compiler_params=pltpu.CompilerParams(
            dimension_semantics=("parallel", "parallel"),
            vmem_limit_bytes=vmem_limit),
    )(x, x, x)


def _sobel_reference(image, in_channels=2):
    """Pure-jnp reference: 3x3 cross-correlation with zero padding (exact f32)."""
    img = image.astype(jnp.float32)
    N, C, H, W = img.shape
    p = jnp.pad(img, ((0, 0), (0, 0), (1, 1), (1, 1)))

    def conv(ch, k):
        acc = jnp.zeros((N, H, W), jnp.float32)
        for dr in range(3):
            for dc in range(3):
                w = k[dr][dc]
                if w != 0.0:
                    acc = acc + w * p[:, ch, dr:dr + H, dc:dc + W]
        return acc[:, None, :, :]

    if in_channels == 2:
        return jnp.concatenate(
            [conv(0, SOBEL_DX), conv(1, SOBEL_DY),
             conv(1, SOBEL_DX), conv(0, SOBEL_DY)], axis=1)
    return jnp.concatenate([conv(0, SOBEL_DX), conv(0, SOBEL_DY)], axis=1)


if __name__ == "__main__":
    key = jax.random.PRNGKey(0)

    # Test 1: module-typical small shape (whole image per step, batch grid of 2).
    x1 = jax.random.normal(key, (2, 2, 16, 16), dtype=jnp.float32)
    out1 = jax.block_until_ready(sobel_pallas(x1, in_channels=2))
    ref1 = _sobel_reference(x1, in_channels=2)
    assert out1.shape == (2, 4, 16, 16)
    assert jnp.allclose(out1, ref1, atol=1e-4, rtol=1e-5), \
        float(jnp.max(jnp.abs(out1 - ref1)))

    # Test 2: lane-dense W=128 (pltpu.roll path) + forced H-tiling with 8-row halos.
    x2 = jax.random.normal(jax.random.fold_in(key, 1), (1, 2, 32, 128),
                           dtype=jnp.float32)
    out2 = jax.block_until_ready(sobel_pallas(x2, in_channels=2, h_tile_rows=8))
    ref2 = _sobel_reference(x2, in_channels=2)
    assert out2.shape == (1, 4, 32, 128)
    assert jnp.allclose(out2, ref2, atol=1e-4, rtol=1e-5), \
        float(jnp.max(jnp.abs(out2 - ref2)))

    # Test 3: in_channels == 1 branch.
    x3 = jax.random.normal(jax.random.fold_in(key, 2), (2, 1, 16, 16),
                           dtype=jnp.float32)
    out3 = jax.block_until_ready(sobel_pallas(x3, in_channels=1))
    ref3 = _sobel_reference(x3, in_channels=1)
    assert out3.shape == (2, 2, 16, 16)
    assert jnp.allclose(out3, ref3, atol=1e-4, rtol=1e-5), \
        float(jnp.max(jnp.abs(out3 - ref3)))

    print("KERNEL_OK")
</pallas_src>

<mosaic_0001>
module attributes {stable_mosaic.version = 11 : i64} {
  func.func @_sobel_kernel(%arg0: i32, %arg1: i32, %arg2: memref<1x2x16x16xf32, #tpu.memory_space<vmem>>, %arg3: memref<1x2x8x16xf32, #tpu.memory_space<vmem>>, %arg4: memref<1x2x8x16xf32, #tpu.memory_space<vmem>>, %arg5: memref<1x4x16x16xf32, #tpu.memory_space<vmem>>) attributes {dimension_semantics = [#tpu.dimension_semantics<parallel>, #tpu.dimension_semantics<parallel>], iteration_bounds = array<i64: 2, 1>, scalar_prefetch = 0 : i64, scratch_operands = 0 : i64, tpu.core_type = #tpu.core_type<tc>, window_params = [{transform_indices = @transform_0, window_bounds = array<i64: 1, 2, 16, 16>}, {transform_indices = @transform_1, window_bounds = array<i64: 1, 2, 8, 16>}, {transform_indices = @transform_2, window_bounds = array<i64: 1, 2, 8, 16>}, {transform_indices = @transform_3, window_bounds = array<i64: 1, 4, 16, 16>}]} {
    %c0 = arith.constant 0 : index
    %c0_0 = arith.constant 0 : index
    %c0_1 = arith.constant 0 : index
    %c0_2 = arith.constant 0 : index
    %0 = vector.load %arg2[%c0, %c0_0, %c0_1, %c0_2] : memref<1x2x16x16xf32, #tpu.memory_space<vmem>>, vector<1x2x16x16xf32>
    %1 = vector.shape_cast %0 : vector<1x2x16x16xf32> to vector<2x16x16xf32>
    %c0_i32 = arith.constant 0 : i32
    %2 = arith.cmpi eq, %arg1, %c0_i32 : i32
    %c0_3 = arith.constant 0 : index
    %c0_4 = arith.constant 0 : index
    %c7 = arith.constant 7 : index
    %c0_5 = arith.constant 0 : index
    %3 = vector.load %arg3[%c0_3, %c0_4, %c7, %c0_5] : memref<1x2x8x16xf32, #tpu.memory_space<vmem>>, vector<1x2x1x16xf32>
    %cst = arith.constant 0.000000e+00 : f32
    %4 = vector.broadcast %cst : f32 to vector<1x2x1x16xf32>
    %5 = arith.select %2, %4, %3 : vector<1x2x1x16xf32>
    %6 = vector.shape_cast %5 : vector<1x2x1x16xf32> to vector<2x1x16xf32>
    %c0_i32_6 = arith.constant 0 : i32
    %7 = arith.cmpi eq, %arg1, %c0_i32_6 : i32
    %c0_7 = arith.constant 0 : index
    %c0_8 = arith.constant 0 : index
    %c0_9 = arith.constant 0 : index
    %c0_10 = arith.constant 0 : index
    %8 = vector.load %arg4[%c0_7, %c0_8, %c0_9, %c0_10] : memref<1x2x8x16xf32, #tpu.memory_space<vmem>>, vector<1x2x1x16xf32>
    %cst_11 = arith.constant 0.000000e+00 : f32
    %9 = vector.broadcast %cst_11 : f32 to vector<1x2x1x16xf32>
    %10 = arith.select %7, %9, %8 : vector<1x2x1x16xf32>
    %11 = vector.shape_cast %10 : vector<1x2x1x16xf32> to vector<2x1x16xf32>
    %cst_12 = arith.constant 0.000000e+00 : f32
    %12 = vector.broadcast %cst_12 : f32 to vector<2x16x1xf32>
    %13 = vector.extract_strided_slice %1 {offsets = [0, 0, 0], sizes = [2, 16, 15], strides = [1, 1, 1]} : vector<2x16x16xf32> to vector<2x16x15xf32>
    %14 = tpu.concatenate %12, %13 in 2 : vector<2x16x1xf32>, vector<2x16x15xf32> -> vector<2x16x16xf32>
    %15 = vector.extract_strided_slice %1 {offsets = [0, 0, 1], sizes = [2, 16, 15], strides = [1, 1, 1]} : vector<2x16x16xf32> to vector<2x16x15xf32>
    %16 = tpu.concatenate %15, %12 in 2 : vector<2x16x15xf32>, vector<2x16x1xf32> -> vector<2x16x16xf32>
    %cst_13 = arith.constant 2.000000e+00 : f32
    %17 = vector.broadcast %cst_13 : f32 to vector<2x16x16xf32>
    %18 = arith.mulf %17, %1 : vector<2x16x16xf32>
    %19 = arith.addf %14, %18 : vector<2x16x16xf32>
    %20 = arith.addf %19, %16 : vector<2x16x16xf32>
    %21 = arith.subf %16, %14 : vector<2x16x16xf32>
    %cst_14 = arith.constant 0.000000e+00 : f32
    %22 = vector.broadcast %cst_14 : f32 to vector<2x1x1xf32>
    %23 = vector.extract_strided_slice %6 {offsets = [0, 0, 0], sizes = [2, 1, 15], strides = [1, 1, 1]} : vector<2x1x16xf32> to vector<2x1x15xf32>
    %24 = tpu.concatenate %22, %23 in 2 : vector<2x1x1xf32>, vector<2x1x15xf32> -> vector<2x1x16xf32>
    %25 = vector.extract_strided_slice %6 {offsets = [0, 0, 1], sizes = [2, 1, 15], strides = [1, 1, 1]} : vector<2x1x16xf32> to vector<2x1x15xf32>
    %26 = tpu.concatenate %25, %22 in 2 : vector<2x1x15xf32>, vector<2x1x1xf32> -> vector<2x1x16xf32>
    %cst_15 = arith.constant 2.000000e+00 : f32
    %27 = vector.broadcast %cst_15 : f32 to vector<2x1x16xf32>
    %28 = arith.mulf %27, %6 : vector<2x1x16xf32>
    %29 = arith.addf %24, %28 : vector<2x1x16xf32>
    %30 = arith.addf %29, %26 : vector<2x1x16xf32>
    %31 = arith.subf %26, %24 : vector<2x1x16xf32>
    %cst_16 = arith.constant 0.000000e+00 : f32
    %32 = vector.broadcast %cst_16 : f32 to vector<2x1x1xf32>
    %33 = vector.extract_strided_slice %11 {offsets = [0, 0, 0], sizes = [2, 1, 15], strides = [1, 1, 1]} : vector<2x1x16xf32> to vector<2x1x15xf32>
    %34 = tpu.concatenate %32, %33 in 2 : vector<2x1x1xf32>, vector<2x1x15xf32> -> vector<2x1x16xf32>
    %35 = vector.extract_strided_slice %11 {offsets = [0, 0, 1], sizes = [2, 1, 15], strides = [1, 1, 1]} : vector<2x1x16xf32> to vector<2x1x15xf32>
    %36 = tpu.concatenate %35, %32 in 2 : vector<2x1x15xf32>, vector<2x1x1xf32> -> vector<2x1x16xf32>
    %cst_17 = arith.constant 2.000000e+00 : f32
    %37 = vector.broadcast %cst_17 : f32 to vector<2x1x16xf32>
    %38 = arith.mulf %37, %11 : vector<2x1x16xf32>
    %39 = arith.addf %34, %38 : vector<2x1x16xf32>
    %40 = arith.addf %39, %36 : vector<2x1x16xf32>
    %41 = arith.subf %36, %34 : vector<2x1x16xf32>
    %42 = tpu.iota {dimensions = array<i32: 1>} : vector<1x16x16xi32>
    %c0_i32_18 = arith.constant 0 : i32
    %43 = vector.broadcast %c0_i32_18 : i32 to vector<1x16x16xi32>
    %44 = arith.cmpi eq, %42, %43 : vector<1x16x16xi32>
    %c1_i32 = arith.constant 1 : i32
    %45 = tpu.dynamic_rotate %20 by %c1_i32 dim 1 : vector<2x16x16xf32>, i32 -> vector<2x16x16xf32>
    %46 = vector.shape_cast %44 : vector<1x16x16xi1> to vector<1x16x16xi1>
    %47 = vector.broadcast %46 : vector<1x16x16xi1> to vector<2x16x16xi1>
    %48 = vector.shape_cast %30 : vector<2x1x16xf32> to vector<2x1x16xf32>
    %49 = vector.broadcast %48 : vector<2x1x16xf32> to vector<2x16x16xf32>
    %50 = arith.select %47, %49, %45 : vector<2x16x16xi1>, vector<2x16x16xf32>
    %c15_i32 = arith.constant 15 : i32
    %51 = vector.broadcast %c15_i32 : i32 to vector<1x16x16xi32>
    %52 = arith.cmpi eq, %42, %51 : vector<1x16x16xi32>
    %c15_i32_19 = arith.constant 15 : i32
    %53 = tpu.dynamic_rotate %20 by %c15_i32_19 dim 1 : vector<2x16x16xf32>, i32 -> vector<2x16x16xf32>
    %54 = vector.shape_cast %52 : vector<1x16x16xi1> to vector<1x16x16xi1>
    %55 = vector.broadcast %54 : vector<1x16x16xi1> to vector<2x16x16xi1>
    %56 = vector.shape_cast %40 : vector<2x1x16xf32> to vector<2x1x16xf32>
    %57 = vector.broadcast %56 : vector<2x1x16xf32> to vector<2x16x16xf32>
    %58 = arith.select %55, %57, %53 : vector<2x16x16xi1>, vector<2x16x16xf32>
    %59 = tpu.iota {dimensions = array<i32: 1>} : vector<1x16x16xi32>
    %c0_i32_20 = arith.constant 0 : i32
    %60 = vector.broadcast %c0_i32_20 : i32 to vector<1x16x16xi32>
    %61 = arith.cmpi eq, %59, %60 : vector<1x16x16xi32>
    %c1_i32_21 = arith.constant 1 : i32
    %62 = tpu.dynamic_rotate %21 by %c1_i32_21 dim 1 : vector<2x16x16xf32>, i32 -> vector<2x16x16xf32>
    %63 = vector.shape_cast %61 : vector<1x16x16xi1> to vector<1x16x16xi1>
    %64 = vector.broadcast %63 : vector<1x16x16xi1> to vector<2x16x16xi1>
    %65 = vector.shape_cast %31 : vector<2x1x16xf32> to vector<2x1x16xf32>
    %66 = vector.broadcast %65 : vector<2x1x16xf32> to vector<2x16x16xf32>
    %67 = arith.select %64, %66, %62 : vector<2x16x16xi1>, vector<2x16x16xf32>
    %c15_i32_22 = arith.constant 15 : i32
    %68 = vector.broadcast %c15_i32_22 : i32 to vector<1x16x16xi32>
    %69 = arith.cmpi eq, %59, %68 : vector<1x16x16xi32>
    %c15_i32_23 = arith.constant 15 : i32
    %70 = tpu.dynamic_rotate %21 by %c15_i32_23 dim 1 : vector<2x16x16xf32>, i32 -> vector<2x16x16xf32>
    %71 = vector.shape_cast %69 : vector<1x16x16xi1> to vector<1x16x16xi1>
    %72 = vector.broadcast %71 : vector<1x16x16xi1> to vector<2x16x16xi1>
    %73 = vector.shape_cast %41 : vector<2x1x16xf32> to vector<2x1x16xf32>
    %74 = vector.broadcast %73 : vector<2x1x16xf32> to vector<2x16x16xf32>
    %75 = arith.select %72, %74, %70 : vector<2x16x16xi1>, vector<2x16x16xf32>
    %76 = arith.subf %58, %50 : vector<2x16x16xf32>
    %77 = vector.shape_cast %76 : vector<2x16x16xf32> to vector<1x2x16x16xf32>
    %cst_24 = arith.constant 2.000000e+00 : f32
    %78 = vector.broadcast %cst_24 : f32 to vector<2x16x16xf32>
    %79 = arith.mulf %78, %21 : vector<2x16x16xf32>
    %80 = arith.addf %67, %79 : vector<2x16x16xf32>
    %81 = arith.addf %80, %75 : vector<2x16x16xf32>
    %82 = vector.shape_cast %81 : vector<2x16x16xf32> to vector<1x2x16x16xf32>
    %83 = vector.extract_strided_slice %77 {offsets = [0, 0, 0, 0], sizes = [1, 1, 16, 16], strides = [1, 1, 1, 1]} : vector<1x2x16x16xf32> to vector<1x1x16x16xf32>
    %84 = vector.shape_cast %83 : vector<1x1x16x16xf32> to vector<1x16x16xf32>
    %c0_25 = arith.constant 0 : index
    %c0_26 = arith.constant 0 : index
    %c0_27 = arith.constant 0 : index
    %c0_28 = arith.constant 0 : index
    %85 = vector.load %arg5[%c0_25, %c0_26, %c0_27, %c0_28] : memref<1x4x16x16xf32, #tpu.memory_space<vmem>>, vector<1x1x16x16xf32>
    %86 = vector.shape_cast %85 : vector<1x1x16x16xf32> to vector<1x16x16xf32>
    %87 = vector.shape_cast %84 : vector<1x16x16xf32> to vector<1x1x16x16xf32>
    tpu.vector_store %arg5[%c0_25, %c0_26, %c0_27, %c0_28], %87 {strides = array<i32>} : memref<1x4x16x16xf32, #tpu.memory_space<vmem>>, vector<1x1x16x16xf32>,
    %88 = vector.extract_strided_slice %82 {offsets = [0, 1, 0, 0], sizes = [1, 1, 16, 16], strides = [1, 1, 1, 1]} : vector<1x2x16x16xf32> to vector<1x1x16x16xf32>
    %89 = vector.shape_cast %88 : vector<1x1x16x16xf32> to vector<1x16x16xf32>
    %c0_29 = arith.constant 0 : index
    %c1 = arith.constant 1 : index
    %c0_30 = arith.constant 0 : index
    %c0_31 = arith.constant 0 : index
    %90 = vector.load %arg5[%c0_29, %c1, %c0_30, %c0_31] : memref<1x4x16x16xf32, #tpu.memory_space<vmem>>, vector<1x1x16x16xf32>
    %91 = vector.shape_cast %90 : vector<1x1x16x16xf32> to vector<1x16x16xf32>
    %92 = vector.shape_cast %89 : vector<1x16x16xf32> to vector<1x1x16x16xf32>
    tpu.vector_store %arg5[%c0_29, %c1, %c0_30, %c0_31], %92 {strides = array<i32>} : memref<1x4x16x16xf32, #tpu.memory_space<vmem>>, vector<1x1x16x16xf32>,
    %93 = vector.extract_strided_slice %77 {offsets = [0, 1, 0, 0], sizes = [1, 1, 16, 16], strides = [1, 1, 1, 1]} : vector<1x2x16x16xf32> to vector<1x1x16x16xf32>
    %94 = vector.shape_cast %93 : vector<1x1x16x16xf32> to vector<1x16x16xf32>
    %c0_32 = arith.constant 0 : index
    %c2 = arith.constant 2 : index
    %c0_33 = arith.constant 0 : index
    %c0_34 = arith.constant 0 : index
    %95 = vector.load %arg5[%c0_32, %c2, %c0_33, %c0_34] : memref<1x4x16x16xf32, #tpu.memory_space<vmem>>, vector<1x1x16x16xf32>
    %96 = vector.shape_cast %95 : vector<1x1x16x16xf32> to vector<1x16x16xf32>
    %97 = vector.shape_cast %94 : vector<1x16x16xf32> to vector<1x1x16x16xf32>
    tpu.vector_store %arg5[%c0_32, %c2, %c0_33, %c0_34], %97 {strides = array<i32>} : memref<1x4x16x16xf32, #tpu.memory_space<vmem>>, vector<1x1x16x16xf32>,
    %98 = vector.extract_strided_slice %82 {offsets = [0, 0, 0, 0], sizes = [1, 1, 16, 16], strides = [1, 1, 1, 1]} : vector<1x2x16x16xf32> to vector<1x1x16x16xf32>
    %99 = vector.shape_cast %98 : vector<1x1x16x16xf32> to vector<1x16x16xf32>
    %c0_35 = arith.constant 0 : index
    %c3 = arith.constant 3 : index
    %c0_36 = arith.constant 0 : index
    %c0_37 = arith.constant 0 : index
    %100 = vector.load %arg5[%c0_35, %c3, %c0_36, %c0_37] : memref<1x4x16x16xf32, #tpu.memory_space<vmem>>, vector<1x1x16x16xf32>
    %101 = vector.shape_cast %100 : vector<1x1x16x16xf32> to vector<1x16x16xf32>
    %102 = vector.shape_cast %99 : vector<1x16x16xf32> to vector<1x1x16x16xf32>
    tpu.vector_store %arg5[%c0_35, %c3, %c0_36, %c0_37], %102 {strides = array<i32>} : memref<1x4x16x16xf32, #tpu.memory_space<vmem>>, vector<1x1x16x16xf32>,
    return
  }
  func.func @transform_0(%arg0: i32, %arg1: i32) -> (i32, i32, i32, i32) {
    %c0_i32 = arith.constant 0 : i32
    %c0_i32_0 = arith.constant 0 : i32
    %c0_i32_1 = arith.constant 0 : i32
    return %arg0, %c0_i32, %arg1, %c0_i32_0 : i32, i32, i32, i32
  }
  func.func @transform_1(%arg0: i32, %arg1: i32) -> (i32, i32, i32, i32) {
    %c0_i32 = arith.constant 0 : i32
    %c0_i32_0 = arith.constant 0 : i32
    %c0_i32_1 = arith.constant 0 : i32
    %c0_i32_2 = arith.constant 0 : i32
    return %arg0, %c0_i32, %c0_i32_0, %c0_i32_1 : i32, i32, i32, i32
  }
  func.func @transform_2(%arg0: i32, %arg1: i32) -> (i32, i32, i32, i32) {
    %c0_i32 = arith.constant 0 : i32
    %c0_i32_0 = arith.constant 0 : i32
    %c0_i32_1 = arith.constant 0 : i32
    %c0_i32_2 = arith.constant 0 : i32
    return %arg0, %c0_i32, %c0_i32_0, %c0_i32_1 : i32, i32, i32, i32
  }
  func.func @transform_3(%arg0: i32, %arg1: i32) -> (i32, i32, i32, i32) {
    %c0_i32 = arith.constant 0 : i32
    %c0_i32_0 = arith.constant 0 : i32
    %c0_i32_1 = arith.constant 0 : i32
    return %arg0, %c0_i32, %arg1, %c0_i32_0 : i32, i32, i32, i32
  }
}

</mosaic_0001>

<bundles_post_ra>
// kernel: tpu_custom_call.1
= control target key start
LH: loop header
LB: loop body
LE: loop exit
PB: predicated region body
PF: predicated region fallthrough
CT: control target
= control target key end

     0   :  { %s1320_s0 = inlined_call_operand.hbm [shape: f32[2,2,16,16], index: 0, kind: input, shape index: {}]   ;;  %s1321_s1 = inlined_call_operand.hbm [shape: f32[2,2,16,16], index: 1, kind: input, shape index: {}]   ;;  %s1322_s2 = inlined_call_operand.hbm [shape: f32[2,2,16,16], index: 2, kind: input, shape index: {}]   ;;  %s1323_s3 = inlined_call_operand.hbm [shape: f32[2,4,16,16], index: 3, kind: output, shape index: {}]  }
   0x1   :  { %1329 = sst [smem:[#allocation17_spill]] %s1321_s1 }
   0x2   :  { %8 = vsyncpa [#allocation3], 0 }
   0x3   :  { %10 = vsyncpa [#allocation3 + $0x1], 0 }
   0x4   :  { %11 = vsyncpa [#allocation6], 0 }
   0x5   :  { %13 = vsyncpa [#allocation6 + $0x1], 0 }
   0x6   :  { %14 = vsyncpa [#allocation4], 0 }
   0x7   :  { %16 = vsyncpa [#allocation4 + $0x1], 0  ;;  %s1002_s12 = smov 0   ;;  %s1004_s13 = smov 0  }
   0x8   :  { %s1006_s14 = smov 0   ;;  %s1008_s15 = smov 0  }
   0x9   :  { %s1010_s16 = smov 0   ;;  %s1012_s17 = smov 0  }
   0xa LB: > { %1330 = sst [smem:[#allocation12_spill]] %s960_s14  ;;  %s1033_s18 = sadd.s32 4294967295, %s972_s17   ;;  %s972_s17 = sphi %s1012_s17, %s22_s17   ;;  %s968_s16 = sphi %s1010_s16, %s1349_s16   ;;  %s964_s15 = sphi %s1008_s15, %s1345_s15   ;;  %s960_s14 = sphi %s1006_s14, %s1344_s14   ;;  %s956_s13 = sphi %s1004_s13, %s1348_s13   ;;  %s952_s12 = sphi %s1002_s12, %s1347_s12  }
   0xb   : > { %1331 = sst [smem:[#allocation13_spill]] %s968_s16  ;;  %s664_s19 = sadd.s32 4294967294, %s972_s17  }
   0xc   : > { %1332 = sst [smem:[#allocation14_spill]] %s972_s17  ;;  %s34_s20 = sadd.s32 1, %s968_s16 }
   0xd   : > { %s43_s21 = sadd.s32 1, %s960_s14  ;;  %p36_p0 = scmp.ge.s32.totalorder %s34_s20, 2 }
   0xe   : > { %p50_p1 = scmp.ne.s32.totalorder %s960_s14, %s956_s13  ;;  %p51_p2 = scmp.eq.s32.totalorder %s972_s17, 0 }
   0xf   : > { %p56_p3 = scmp.ne.s32.totalorder %s956_s13, %s952_s12  ;;  %s1351_s20 = smov (%p36_p0, %s34_s20), 0 }
  0x10   : > { %1333 = sst [smem:[#allocation15_spill]] %s1351_s20  ;;  %p1045_p4 = por %p51_p2, %p50_p1 }
  0x11   : > { %p57_p5 = scmp.eq.s32.totalorder %s1033_s18, 0  ;;  %s38_s23 = ssub.s32 %s968_s16, %s1351_s20 }
  0x12   : > { %p134_p6 = scmp.eq.s32.totalorder %s1033_s18, 1  ;;  %p41_p7 = scmp.eq.s32.totalorder %s38_s23, 0 }
  0x13   : > { %p1053_p8 = por %p57_p5, %p56_p3  ;;  %p140_p10 = scmp.eq.s32.totalorder %s664_s19, 1 }
  0x14   : > { %p1057_p9 = por %p134_p6, %p50_p1  ;;  %p666_p12 = scmp.ge.s32.totalorder %s972_s17, 2 }
  0x15   : > { %s1062_s26 = scalar_select %p41_p7, %s960_s14, %s43_s21  }
  0x16   : > { %p1064_p11 = por %p140_p10, %p56_p3  ;;  %p718_p13 = scmp.lt.s32.totalorder %s972_s17, 2 }
  0x17   : > { %1337 = sst [smem:[#allocation16_spill]] %s1062_s26  ;;  %s1071_s28 = sand.u32 1, %s960_s14  }
  0x18   : > { %s1074_s29 = sshll.u32 %s968_s16, 5  ;;  %p1078_p0 = pnand %p718_p13, %p1045_p4 }
  0x19   : > { %s184_s4 = sand.u32 1, %s972_s17   ;;  %s670_s5 = sshll.u32 %s1071_s28, 4 }
  0x1a   : > { %s1340_s1 = sld [smem:[#allocation17_spill]]  ;;  %s188_s10 = scalar_lea.vmem [#allocation5], %s670_s5 }
  0x1b   : > { %s196_s11 = sshll.u32 %s188_s10, 4  ;;  %s185_s19 = scalar_lea.sflag [#allocation6], %s184_s4  ;;  %s197_s11 = int_to_ptr.vmem [resolvable:$true] %s196_s11 }
  0x1c   : > { %s974_s21 = smov 256   ;;  %s975_s22 = smov 128  }
  0x1d   : > { %s976_s23 = smov 8   ;;  %s210_s20 = scalar_lea.vmem [#allocation7], %s670_s5 }
  0x1e   : > { %s218_s6 = sshll.u32 %s210_s20, 4  ;;  %p676_p1 = scmp.ge.s32.totalorder %s972_s17, 1  ;;  %s219_s6 = int_to_ptr.vmem [resolvable:$true] %s218_s6 }
  0x1f   : > { %p226_p2 = scmp.lt.s32.totalorder %s972_s17, 3  ;;  %s161_s14 = scalar_lea.sflag [#allocation3], %s1071_s28 }
  0x20   : > { %s193_s8 = scalar_lea.hbm %s1340_s1, %s1074_s29  ;;  %s171_s1 = scalar_lea.hbm %s1320_s0, %s1074_s29 }
  0x21   : > { %s194_s9 = sshll.u32 %s193_s8, 4  ;;  %p1092_p3 = pnand %p676_p1, %p226_p2  ;;  %s195_s9 = int_to_ptr.hbm [resolvable:$true] %s194_s9 }
  0x22   : > { %710 = dma.hbm_to_vmem [thread:$0]  (!%p1078_p0), %s195_s9, 256, %s197_s11, %s185_s19, %s974_s21, %s975_s22, %s976_s23  }
  0x23   : > { %s667_s8 = sshll.u32 %s1071_s28, 5  ;;  %s172_s16 = sshll.u32 %s171_s1, 4  ;;  %s173_s16 = int_to_ptr.hbm [resolvable:$true] %s172_s16 }
  0x24   : > { %s164_s26 = scalar_lea.vmem [#allocation2], %s667_s8  ;;  %s215_s11 = scalar_lea.hbm %s1322_s2, %s1074_s29 }
  0x25   : > { %s174_s9 = sshll.u32 %s164_s26, 4  ;;  %s216_s17 = sshll.u32 %s215_s11, 4  ;;  %s175_s9 = int_to_ptr.vmem [resolvable:$true] %s174_s9  ;;  %s217_s17 = int_to_ptr.hbm [resolvable:$true] %s216_s17 }
  0x26   : > { %707 = dma.hbm_to_vmem [thread:$0]  (!%p1078_p0), %s173_s16, 512, %s175_s9, %s161_s14, %s975_s22, %s975_s22, %s976_s23  }
  0x27   : > { %713 = dma.hbm_to_vmem [thread:$0]  (!%p1078_p0), %s217_s17, 256, %s219_s6, %s185_s19, %s974_s21, %s975_s22, %s976_s23  }
  0x28   : > { %230 = sbr.rel (%p1092_p3) target bundleno = 210 (0xd2), region = 32  ;;  %s1113_s1 = sand.u32 (!%p1092_p3), 1, %s956_s13  }
  0x29   : > { %s677_s26 = sshll.u32 (!%p1092_p3), %s1113_s1, 5  ;;  %s233_s8 = scalar_lea.sflag (!%p1092_p3), [#allocation3], %s1113_s1 }
  0x2a   : > { %s236_s4 = scalar_lea.vmem (!%p1092_p3), [#allocation2], %s677_s26 }
  0x2d   : > { %939 = dma.done.wait (%p1053_p8), %s233_s8, 512  }
  0x2e   : > { %941 = vsyncadd (%p1053_p8), %s233_s8, 4294966784  ;;  %s242_s14 = sand.u32 1, %s1033_s18  }
  0x2f   : > { %s243_s16 = scalar_lea.sflag [#allocation6], %s242_s14 }
  0x30   : > { %943 = dma.done.wait (%p1053_p8), %s243_s16, 512  }
  0x31   : > { %945 = vsyncadd (%p1053_p8), %s243_s16, 4294966784  ;;  %v294_v0 = vld [vmem:[%s236_s4 + $0x10] sm:$0xff]  ;;  %v292_v1 = vld [vmem:[%s236_s4] sm:$0xff]  ;;  %s977_s17 = smov 1   ;;  %s978_s28 = smov 127   ;;  %v979_v4 = vmov 0.0   ;;  %v414_v10 = vlaneseq }
  0x32   : > { %316 = vrot.lane.b32.xlu1 %v294_v0, %s977_s17  ;;  %312 = vrot.lane.b32.xlu0 %v292_v1, %s977_s17  ;;  %v295_v2 = vld [vmem:[%s236_s4 + $0x18] sm:$0xff]  ;;  %v293_v3 = vld [vmem:[%s236_s4 + $0x8] sm:$0xff]  ;;  %vm324_vm0 = vcmask 7168   ;;  %vm341_vm1 = vcmask 121856   ;;  %v346_v11 = vmul.f32 2.0, %v292_v1  ;;  %v348_v20 = vmul.f32 2.0, %v294_v0 }
  0x33   : > { %329 = vrot.lane.b32.xlu2 %v292_v1, %s978_s28  ;;  %v347_v12 = vmul.f32 2.0, %v293_v3  ;;  %v1129_v18 = vshrl.u32 %v414_v10, 7  ;;  %v349_v27 = vmul.f32 2.0, %v295_v2  ;;  %vm503_vm6 = vcmask 130048   ;;  %s680_s18 = sshll.u32 %s1113_s1, 6  ;;  %s695_s24 = sshll.u32 %s964_s15, 6 }
  0x34   : > { %s529_s30 = scalar_lea.hbm %s1323_s3, %s695_s24  ;;  %s289_s19 = scalar_lea.vmem [#allocation8], %s680_s18 }
  0x35   : > { %vm423_vm2 = vcmp.lt.s32.totalorder %v1129_v18, 1  ;;  %vm444_vm3 = vcmp.lt.s32.totalorder %v1129_v18, 7  ;;  %v1147_v34 = vadd.s32 8, %v1129_v18  ;;  %vm417_vm5 = vcmp.eq.s32.totalorder %v1129_v18, 0  ;;  %s530_s21 = sshll.u32 %s289_s19, 4  ;;  %s532_s22 = sshll.u32 %s529_s30, 4  ;;  %s531_s21 = int_to_ptr.vmem [resolvable:$true] %s530_s21  ;;  %s533_s22 = int_to_ptr.hbm [resolvable:$true] %s532_s22 }
  0x36   : > { %s516_s23 = scalar_lea.sflag [#allocation4], %s1113_s1  ;;  %s900_s6 = sshra.s32 %s533_s22, 4  ;;  %s901_s6 = int_to_ptr.hbm [resolvable:$true] %s900_s6 }
  0x37   : > { %vm439_vm4 = vcmp.eq.s32.totalorder %v1147_v34, 15  ;;  %s902_s7 = scalar_lea.hbm %s901_s6, 64  ;;  %s906_s5 = scalar_lea.hbm %s1323_s3, 128 }
  0x38   : > { %p903_p4 = scmp.ne.s32.totalorder %s901_s6, %s902_s7  ;;  %p907_p7 = scmp.lt.s32.totalorder %s901_s6, %s1323_s3 }
  0x39   : > { %p908_p8 = scmp.lt.s32.totalorder %s906_s5, %s902_s7 }
  0x3a   : > { %318 = vrot.lane.b32.xlu1 %v295_v2, %s977_s17  ;;  %314 = vrot.lane.b32.xlu0 %v293_v3, %s977_s17  ;;  %p904_p5 = pnand %p903_p4, %p1057_p9 }
  0x3b   : > { %331 = vrot.lane.b32.xlu2 %v293_v3, %s978_s28  ;;  %p909_p10 = por %p908_p8, %p907_p7 }
  0x3c   : > { %p905_p6 = pneg %p904_p5 }
  0x3e   : > { %p910_p13 = pnand %p909_p10, %p905_p6 }
  0x42   : > { %335 = vrot.lane.b32.xlu1 %v295_v2, %s978_s28  ;;  %333 = vrot.lane.b32.xlu0 %v294_v0, %s978_s28 }
  0x43   : > { %777 = vrot.lane.b32.xlu2 %v979_v4, %s977_s17 }
  0x4a   : > { %787 = vrot.lane.b32.xlu1 %v979_v4, %s977_s17  ;;  %782 = vrot.lane.b32.xlu0 %v979_v4, %s978_s28 }
  0x4b   : > { %792 = vrot.lane.b32.xlu2 %v979_v4, %s978_s28 }
  0x8d   : > { %v330_v5 = vpop.permute.xlu2 %329 }
  0x8e   : > { %v342_v16 = vsel %vm341_vm1, %v330_v5, 0.0 }
  0x95   : > { %v332_v6 = vpop.permute.xlu2 %331 }
  0x96   : > { %v343_v17 = vsel %vm341_vm1, %v332_v6, 0.0 }
  0x9d   : > { %v778_v9 = vpop.permute.xlu2 %777 }
  0x9e   : > { %v780_v21 = vunpack.i.h.bf16 %v778_v9  ;;  %v779_v22 = vunpack.i.l.bf16 %v778_v9 }
  0xa0   : > { %v1141_v32 = vsel %vm324_vm0, 0.0, %v780_v21  ;;  %v1144_v33 = vsel %vm324_vm0, 0.0, %v779_v22 }
  0xa4   : > { %v317_v7 = vpop.permute.xlu1 %316  ;;  %v313_v8 = vpop.permute.xlu0 %312 }
  0xa5   : > { %v325_v13 = vsel %vm324_vm0, 0.0, %v313_v8  ;;  %v327_v23 = vsel %vm324_vm0, 0.0, %v317_v7  ;;  %v793_v29 = vpop.permute.xlu2 %792 }
  0xa6   : > { %v350_v24 = vadd.f32 %v346_v11, %v325_v13  ;;  %v1133_v26 = vsub.f32 %v342_v16, %v325_v13  ;;  %v352_v31 = vadd.f32 %v348_v20, %v327_v23  ;;  %v795_v37 = vunpack.i.h.bf16 %v793_v29 }
  0xa7   : > { %v794_v38 = vunpack.i.l.bf16 %v793_v29 }
  0xa8   : > { %v1149_v35 = vadd.f32 %v350_v24, %v342_v16  ;;  %v459_v39 = vrot.slane %v1133_v26, 7  ;;  %v473_v40 = vrot.slane %v1133_v26, 1  ;;  %v1157_v45 = vmul.f32 2.0, %v1133_v26 }
  0xa9   : > { %v405_v55 = vsel %vm341_vm1, %v795_v37, 0.0  ;;  %v404_v56 = vsel %vm341_vm1, %v794_v38, 0.0 }
  0xaa   : > { %v419_v57 = vrot.slane %v1149_v35, 7  ;;  %v440_v61 = vrot.slane %v1149_v35, 1 }
  0xac   : > { %v319_v14 = vpop.permute.xlu1 %318  ;;  %v315_v15 = vpop.permute.xlu0 %314 }
  0xad   : > { %v326_v19 = vsel %vm324_vm0, 0.0, %v315_v15  ;;  %v328_v30 = vsel %vm324_vm0, 0.0, %v319_v14 }
  0xae   : > { %v351_v25 = vadd.f32 %v347_v12, %v326_v19  ;;  %v1135_v28 = vsub.f32 %v343_v17, %v326_v19  ;;  %v353_v41 = vadd.f32 %v349_v27, %v328_v30 }
  0xb0   : > { %v1151_v36 = vadd.f32 %v351_v25, %v343_v17  ;;  %v461_v42 = vrot.slane %v1135_v28, 7  ;;  %v475_v46 = vrot.slane %v1135_v28, 1  ;;  %v492_v54 = vmul.f32 2.0, %v1135_v28 }
  0xb2   : > { %v421_v53 = vrot.slane %v1151_v36, 7  ;;  %v442_v58 = vrot.slane %v1151_v36, 1  ;;  %v463_v59 = vsel %vm423_vm2, %v459_v39, %v461_v42  ;;  %v1182_v62 = vsel %vm423_vm2, %v461_v42, %v459_v39 }
  0xb3   : > { %v479_v63 = vsel %vm444_vm3, %v475_v46, %v473_v40  ;;  %v496_v6 = vadd.f32 %v492_v54, %v463_v59 }
  0xb4   : > { %v336_v43 = vpop.permute.xlu1 %335  ;;  %v334_v44 = vpop.permute.xlu0 %333  ;;  %v424_v5 = vsel %vm423_vm2, %v419_v57, %v421_v53  ;;  %v447_v9 = vsel %vm444_vm3, %v442_v58, %v440_v61  ;;  %v426_v34 = vsel %vm423_vm2, %v421_v53, %v419_v57 }
  0xb5   : > { %v345_v47 = vsel %vm341_vm1, %v336_v43, 0.0  ;;  %v344_v48 = vsel %vm341_vm1, %v334_v44, 0.0 }
  0xb6   : > { %v1162_v49 = vadd.f32 %v353_v41, %v345_v47  ;;  %v1164_v50 = vsub.f32 %v345_v47, %v328_v30  ;;  %v1166_v51 = vadd.f32 %v352_v31, %v344_v48  ;;  %v1168_v52 = vsub.f32 %v344_v48, %v327_v23 }
  0xb8   : > { %v422_v60 = vrot.slane %v1162_v49, 7  ;;  %v420_v0 = vrot.slane %v1166_v51, 7  ;;  %v443_v1 = vrot.slane %v1162_v49, 1  ;;  %v462_v2 = vrot.slane %v1164_v50, 7 }
  0xb9   : > { %v441_v3 = vrot.slane %v1166_v51, 1  ;;  %v460_v4 = vrot.slane %v1168_v52, 7  ;;  %v476_v7 = vrot.slane %v1164_v50, 1  ;;  %v474_v8 = vrot.slane %v1168_v52, 1 }
  0xba   : > { %v494_v10 = vmul.f32 2.0, %v1164_v50  ;;  %v425_v11 = vsel %vm423_vm2, %v420_v0, %v422_v60  ;;  %v493_v12 = vmul.f32 2.0, %v1168_v52  ;;  %v427_v15 = vsel %vm423_vm2, %v422_v60, %v420_v0 }
  0xbb   : > { %v448_v20 = vsel %vm444_vm3, %v443_v1, %v441_v3  ;;  %v464_v21 = vsel %vm423_vm2, %v460_v4, %v462_v2  ;;  %v466_v22 = vsel %vm423_vm2, %v462_v2, %v460_v4  ;;  %v480_v24 = vsel %vm444_vm3, %v476_v7, %v474_v8 }
  0xbc   : > { %v788_v13 = vpop.permute.xlu1 %787  ;;  %v783_v14 = vpop.permute.xlu0 %782  ;;  %v498_v39 = vadd.f32 %v494_v10, %v464_v21 }
  0xbd   : > { %v790_v16 = vunpack.i.h.bf16 %v788_v13  ;;  %v789_v17 = vunpack.i.l.bf16 %v788_v13  ;;  %v785_v19 = vunpack.i.h.bf16 %v783_v14  ;;  %v784_v23 = vunpack.i.l.bf16 %v783_v14 }
  0xbf   : > { %v397_v25 = vsel %vm324_vm0, 0.0, %v790_v16  ;;  %v396_v27 = vsel %vm324_vm0, 0.0, %v789_v17  ;;  %v379_v29 = vsel %vm341_vm1, %v785_v19, 0.0  ;;  %v378_v43 = vsel %vm341_vm1, %v784_v23, 0.0 }
  0xc0   : > { %v411_v30 = vadd.f32 %v405_v55, %v397_v25  ;;  %v413_v31 = vsub.f32 %v405_v55, %v397_v25  ;;  %v410_v37 = vadd.f32 %v404_v56, %v396_v27  ;;  %v412_v38 = vsub.f32 %v404_v56, %v396_v27 }
  0xc1   : > { %v385_v41 = vadd.f32 %v379_v29, %v1141_v32  ;;  %v387_v42 = vsub.f32 %v379_v29, %v1141_v32  ;;  %v384_v52 = vadd.f32 %v378_v43, %v1144_v33  ;;  %v386_v54 = vsub.f32 %v378_v43, %v1144_v33 }
  0xc2   : > { %v454_v44 = vperm.slane %v411_v30, 0  ;;  %v482_v47 = vperm.slane %v413_v31, 0  ;;  %v453_v48 = vperm.slane %v410_v37, 0  ;;  %v481_v49 = vperm.slane %v412_v38, 0 }
  0xc3   : > { %v433_v50 = vperm.slane %v385_v41, 0  ;;  %v468_v51 = vperm.slane %v387_v42, 0  ;;  %v432_v10 = vperm.slane %v384_v52, 0  ;;  %v467_v13 = vperm.slane %v386_v54, 0 }
  0xc4   : > { %v456_v55 = vsel %vm439_vm4, %v453_v48, %v447_v9  ;;  %v458_v56 = vsel %vm439_vm4, %v454_v44, %v448_v20  ;;  %v484_v32 = vsel %vm439_vm4, %v481_v49, %v479_v63  ;;  %v486_v59 = vsel %vm439_vm4, %v482_v47, %v480_v24 }
  0xc5   : > { %v488_v60 = vsub.f32 %v456_v55, %v424_v5  ;;  %v490_v0 = vsub.f32 %v458_v56, %v425_v11  ;;  %v500_v2 = vadd.f32 %v496_v6, %v484_v32  ;;  %v502_v4 = vadd.f32 %v498_v39, %v486_v59 }
  0xc6   : > { %v436_v33 = vsel %vm417_vm5, %v433_v50, %v427_v15  ;;  %v471_v9 = vsel %vm417_vm5, %v468_v51, %v466_v22  ;;  %v445_v63 = vsel %vm444_vm3, %v440_v61, %v442_v58  ;;  %v446_v5 = vsel %vm444_vm3, %v441_v3, %v443_v1 }
  0xc7   : > { %505 = vst.msk [vmem:[%s289_s19 + $0x8] sm:$0xff] %vm503_vm6, %v488_v60  ;;  %v497_v6 = vadd.f32 %v493_v12, %v471_v9  ;;  %v478_v11 = vsel %vm444_vm3, %v474_v8, %v476_v7  ;;  %v489_v53 = vsub.f32 %v446_v5, %v436_v33  ;;  %v434_v36 = vsel %vm417_vm5, %v432_v10, %v426_v34 }
  0xc8   : > { %682 = vst.msk [vmem:[%s289_s19 + $0x18] sm:$0xff] %vm503_vm6, %v502_v4  ;;  %v469_v35 = vsel %vm417_vm5, %v467_v13, %v1182_v62  ;;  %v487_v58 = vsub.f32 %v445_v63, %v434_v36  ;;  %v477_v1 = vsel %vm444_vm3, %v473_v40, %v475_v46 }
  0xc9   : > { %684 = vst.msk [vmem:[%s289_s19 + $0x28] sm:$0xff] %vm503_vm6, %v490_v0  ;;  %v501_v57 = vadd.f32 %v497_v6, %v478_v11  ;;  %v495_v61 = vadd.f32 %v1157_v45, %v469_v35 }
  0xca   : > { %686 = vst.msk [vmem:[%s289_s19 + $0x38] sm:$0xff] %vm503_vm6, %v500_v2 }
  0xcb   : > { %681 = vst.msk [vmem:[%s289_s19 + $0x10] sm:$0xff] %vm503_vm6, %v501_v57  ;;  %v499_v62 = vadd.f32 %v495_v61, %v477_v1 }
  0xcc   : > { %683 = vst.msk [vmem:[%s289_s19 + $0x20] sm:$0xff] %vm503_vm6, %v489_v53 }
  0xcd   : > { %504 = vst.msk [vmem:[%s289_s19] sm:$0xff] %vm503_vm6, %v487_v58 }
  0xce   : > { %685 = vst.msk [vmem:[%s289_s19 + $0x30] sm:$0xff] %vm503_vm6, %v499_v62 }
  0xcf   : > { %913 = shalt.err (!%p910_p13)
}
  0xd0   : > { %s980_s1 = smov 128   ;;  %s981_s26 = smov 8  }
  0xd1   : > { %702 = dma.vmem_to_hbm [thread:$0]  (%p1057_p9), %s531_s21, 1024, %s533_s22, %s516_s23, %s980_s1, %s980_s1, %s981_s26  }
  0xd2 PF: > { %s1342_s8 = sld [smem:[#allocation14_spill]]  ;;  %s547_s4 = sand.u32 1, %s952_s12  }
  0xd3   : > { %p715_p0 = pnand %p666_p12, %p1064_p11  ;;  %s548_s14 = scalar_lea.sflag [#allocation4], %s547_s4 }
  0xd5   : > { %p716_p1 = pneg %p715_p0 }
  0xd7   : > { %947 = dma.done.wait (%p716_p1), %s548_s14, 1024  }
  0xd8   : > { %949 = vsyncadd (%p716_p1), %s548_s14, 4294966272  ;;  %s22_s17 = sadd.s32 1, %s1342_s8   ;;  %s1343_s16 = sld [smem:[#allocation12_spill]] }
  0xd9   : > { %p19_p2 = scmp.ge.s32.totalorder %s22_s17, 4   ;;  %s1344_s14 = sld [smem:[#allocation16_spill]] }
  0xda   : > { %s1345_s15 = sld [smem:[#allocation13_spill]]  ;;  %s1347_s12 = smov %s956_s13 }
  0xdb   : > { %s1346_s25 = sld [smem:[#allocation15_spill]] }
  0xdd   :  { %21 = sbr.rel (!%p19_p2) target bundleno = 10 (0xa), region = 104 }
  0xde   : > { %s1348_s13 = smov %s1343_s16 }
  0xe1   : > { %s1349_s16 = smov %s1346_s25 }
  0xe2   :  { %554 = vsyncpa [#allocation3], 1 }
  0xe3   :  { %556 = vsyncpa [#allocation3 + $0x1], 1 }
  0xe4   :  { %557 = vsyncpa [#allocation6], 1 }
  0xe5   :  { %559 = vsyncpa [#allocation6 + $0x1], 1 }
  0xe6   :  { %560 = vsyncpa [#allocation4], 1 }
  0xe7   :  { %562 = vsyncpa [#allocation4 + $0x1], 1 }

</bundles_post_ra>
